<compile_context>
chip_gen: v7x
topology: tpu7x:2x2x1
jax: 0.10.0
libtpu: 0.0.40
codegen_flags: <defaults>
</compile_context>

<pallas_src>
import functools

import numpy as np
import jax
import jax.numpy as jnp
from jax.experimental import pallas as pl
from jax.experimental.pallas import tpu as pltpu


# ----------------------------- spiral anchor generation (hoisted, run once) --
def generate_spiral_data(key, points_per_class, num_classes):
    """JAX port of generate_spiral_data_torch (deterministic via `key`)."""
    radius = jnp.linspace(0.0, 1.0, points_per_class)
    xs = []
    for i in range(num_classes):
        key, sub = jax.random.split(key)
        theta = (
            jnp.linspace(i * 4 * np.pi / num_classes,
                         (i + 1) * 4 * np.pi / num_classes,
                         points_per_class)
            + jax.random.normal(sub, (points_per_class,)) * 0.2
        )
        x1 = radius * jnp.sin(theta)
        x2 = radius * jnp.cos(theta)
        xs.append(jnp.stack((x1, x2), axis=1))
    return jnp.concatenate(xs, axis=0)  # (points_per_class * num_classes, 2)


# ----------------------------- Pallas kernel ---------------------------------
def _tlse_loss_kernel(log_sigma_ref, temp_ref, mean_t_ref, e_ref, loss_ref):
    """Spiral TLSE loss, pure-VPU formulation.

    mean_t_ref : (D=2, N) f32 VMEM   -- latent points, pre-transposed in wrapper
    e_ref      : (M, D=2) f32 VMEM   -- spiral anchors (natural layout)
    log_sigma_ref, temp_ref : (1,) f32 SMEM scalars
    loss_ref   : (1,) f32 SMEM output
    """
    D, N = mean_t_ref.shape
    M = e_ref.shape[0]

    log_sigma = log_sigma_ref[0]
    T = temp_ref[0]
    sigma = jnp.exp(log_sigma)
    scale = (-1.0 / (2.0 * sigma * sigma)) / T          # alpha / T (scalar path)

    # Static slices -> no XLU transposes, no lane reductions over D.
    mx = mean_t_ref[0:1, :]        # (1, N)
    my = mean_t_ref[1:2, :]        # (1, N)
    ex = e_ref[:, 0:1]             # (M, 1)
    ey = e_ref[:, 1:2]             # (M, 1)

    # Direct (m - e)^2 pairwise distance, (M, N) slab: M on sublanes, N on lanes.
    dx = ex - mx                   # (M, 1) - (1, N) -> (M, N)
    dy = ey - my
    scaled = scale * (dx * dx + dy * dy)                 # (M, N)

    # logsumexp over the N axis (dim=0 of the PyTorch (N, M) distance matrix)
    # is a lane-axis reduce here; exp goes to the EUP slot.
    row_max = jnp.max(scaled, axis=1, keepdims=True)                      # (M, 1)
    lse = row_max + jnp.log(
        jnp.sum(jnp.exp(scaled - row_max), axis=1, keepdims=True))        # (M, 1)

    # mean over M (sublane reduce); 1/M and log(N) are trace-time constants.
    loss = -T * (jnp.sum(lse) * jnp.float32(1.0 / M))
    # np.log(np.e) == 1.0
    loss = loss + 0.5 * jnp.float32(D) * (2.0 * log_sigma - 1.0) \
                + jnp.float32(np.log(N))
    loss_ref[0] = loss


# ----------------------------- wrapper ----------------------------------------
@functools.partial(jax.jit, static_argnames=("temperature",))
def _tlse_forward(z, log_sigma, e, *, temperature):
    mean_t = z.astype(jnp.float32).T                     # (2, N) layout plumbing
    D, N = mean_t.shape
    M = e.shape[0]

    cost = pl.CostEstimate(
        flops=10 * M * N,                  # sub/sq/add/scale/max/sub/sum per (j,i)
        transcendentals=M * N + M + 2,     # exp per element, log per row, scalar exp
        bytes_accessed=4 * (D * N + D * M + 3),
    )

    return pl.pallas_call(
        _tlse_loss_kernel,
        out_shape=jax.ShapeDtypeStruct((1,), jnp.float32),
        in_specs=[
            pl.BlockSpec(memory_space=pltpu.MemorySpace.SMEM),   # log_sigma scalar
            pl.BlockSpec(memory_space=pltpu.MemorySpace.SMEM),   # temperature scalar
            pl.BlockSpec(memory_space=pltpu.MemorySpace.VMEM),   # mean_t (whole array)
            pl.BlockSpec(memory_space=pltpu.MemorySpace.VMEM),   # e      (whole array)
        ],
        out_specs=pl.BlockSpec(memory_space=pltpu.MemorySpace.SMEM),
        cost_estimate=cost,
    )(
        log_sigma.astype(jnp.float32).reshape(1),
        jnp.full((1,), temperature, jnp.float32),
        mean_t,
        e.astype(jnp.float32),
    )


def latent_layer_forward(data, log_sigma, e, *, temperature):
    """Equivalent of LatentLayer.forward; anchors `e` are precomputed (M, 2)."""
    mean = data["z"]                       # (N, z_dim)
    assert mean.shape[1] == 2 and e.shape[1] == 2, \
        "z_dim must be 2 to match spiral anchors"
    loss = _tlse_forward(mean, jnp.asarray(log_sigma), e,
                         temperature=float(temperature))
    out = dict(data)
    out["lse_loss"] = loss                 # shape (1,), matches torch (log_sigma is (1,))
    return out


# ----------------------------- pure-JAX reference ------------------------------
def reference_loss(mean, e, log_sigma, T):
    diff = mean[:, None, :] - e[None, :, :]
    dist = jnp.sum(diff * diff, axis=2)                # (N, M)
    sigma = jnp.exp(log_sigma)
    alpha = -1.0 / (2.0 * sigma * sigma)
    lse = jax.scipy.special.logsumexp(alpha * dist / T, axis=0)
    loss = -jnp.mean(T * lse)
    return loss + 0.5 * mean.shape[1] * (2.0 * log_sigma - 1.0) + jnp.log(
        jnp.float32(mean.shape[0]))


if __name__ == "__main__":
    key = jax.random.PRNGKey(0)
    kz, kspiral = jax.random.split(key)

    # Small shapes consistent with the module: z is (N, z_dim=2) latent points.
    N, z_dim = 64, 2
    M = 40                # anchors: 5 classes * (M // 5) points each
    temperature = 0.5
    init_log_sigma = -1.0

    # Deterministic parameter init: log_sigma = ones(1) * init_log_sigma
    log_sigma = jnp.ones((1,), jnp.float32) * init_log_sigma

    z = jax.random.normal(kz, (N, z_dim), dtype=jnp.float32)
    data = {"z": z}

    # Spiral anchors are deterministic per key -> compute once, outside forward.
    # Effective anchor count is 5 * (M // 5), mirroring the PyTorch module.
    e = generate_spiral_data(kspiral, M // 5, 5)       # (40, 2)

    out = latent_layer_forward(data, log_sigma, e, temperature=temperature)
    loss = jax.block_until_ready(out["lse_loss"])

    ref = reference_loss(z, e, log_sigma[0], jnp.float32(temperature))
    ref = jax.block_until_ready(ref)

    assert np.allclose(np.asarray(loss)[0], np.asarray(ref), rtol=1e-5, atol=1e-5), (
        loss, ref)
    print("KERNEL_OK")
</pallas_src>

<mosaic_0001>
module attributes {stable_mosaic.version = 11 : i64} {
  func.func @_tlse_loss_kernel(%arg0: memref<1xf32, #tpu.memory_space<smem>>, %arg1: memref<1xf32, #tpu.memory_space<smem>>, %arg2: memref<2x64xf32, #tpu.memory_space<vmem>>, %arg3: memref<40x2xf32, #tpu.memory_space<vmem>>, %arg4: memref<1xf32, #tpu.memory_space<smem>>) attributes {dimension_semantics = [], scalar_prefetch = 0 : i64, scratch_operands = 0 : i64, tpu.core_type = #tpu.core_type<tc>} {
    %c0 = arith.constant 0 : index
    %0 = memref.load %arg0[%c0] : memref<1xf32, #tpu.memory_space<smem>>
    %c0_0 = arith.constant 0 : index
    %1 = memref.load %arg1[%c0_0] : memref<1xf32, #tpu.memory_space<smem>>
    %2 = math.exp %0 : f32
    %cst = arith.constant 2.000000e+00 : f32
    %3 = arith.mulf %cst, %2 : f32
    %4 = arith.mulf %3, %2 : f32
    %cst_1 = arith.constant -1.000000e+00 : f32
    %5 = arith.divf %cst_1, %4 : f32
    %6 = arith.divf %5, %1 : f32
    %c0_2 = arith.constant 0 : index
    %c0_3 = arith.constant 0 : index
    %7 = vector.load %arg2[%c0_2, %c0_3] : memref<2x64xf32, #tpu.memory_space<vmem>>, vector<1x64xf32>
    %c1 = arith.constant 1 : index
    %c0_4 = arith.constant 0 : index
    %8 = vector.load %arg2[%c1, %c0_4] : memref<2x64xf32, #tpu.memory_space<vmem>>, vector<1x64xf32>
    %c0_5 = arith.constant 0 : index
    %c0_6 = arith.constant 0 : index
    %9 = vector.load %arg3[%c0_5, %c0_6] : memref<40x2xf32, #tpu.memory_space<vmem>>, vector<40x1xf32>
    %c0_7 = arith.constant 0 : index
    %c1_8 = arith.constant 1 : index
    %10 = vector.load %arg3[%c0_7, %c1_8] : memref<40x2xf32, #tpu.memory_space<vmem>>, vector<40x1xf32>
    %11 = vector.broadcast %9 : vector<40x1xf32> to vector<40x64xf32>
    %12 = vector.broadcast %7 : vector<1x64xf32> to vector<40x64xf32>
    %13 = arith.subf %11, %12 : vector<40x64xf32>
    %14 = vector.broadcast %10 : vector<40x1xf32> to vector<40x64xf32>
    %15 = vector.broadcast %8 : vector<1x64xf32> to vector<40x64xf32>
    %16 = arith.subf %14, %15 : vector<40x64xf32>
    %17 = arith.mulf %13, %13 : vector<40x64xf32>
    %18 = arith.mulf %16, %16 : vector<40x64xf32>
    %19 = arith.addf %17, %18 : vector<40x64xf32>
    %20 = vector.broadcast %6 : f32 to vector<40x64xf32>
    %21 = arith.mulf %20, %19 : vector<40x64xf32>
    %cst_9 = arith.constant dense<0xFF800000> : vector<40xf32>
    %22 = vector.multi_reduction <maximumf>, %21, %cst_9 [1] : vector<40x64xf32> to vector<40xf32>
    %23 = vector.shape_cast %22 : vector<40xf32> to vector<40x1xf32>
    %24 = vector.broadcast %23 : vector<40x1xf32> to vector<40x64xf32>
    %25 = arith.subf %21, %24 : vector<40x64xf32>
    %26 = math.exp %25 : vector<40x64xf32>
    %cst_10 = arith.constant dense<0.000000e+00> : vector<40xf32>
    %27 = vector.multi_reduction <add>, %26, %cst_10 [1] : vector<40x64xf32> to vector<40xf32>
    %28 = vector.shape_cast %27 : vector<40xf32> to vector<40x1xf32>
    %29 = math.log %28 : vector<40x1xf32>
    %30 = arith.addf %23, %29 : vector<40x1xf32>
    %cst_11 = arith.constant 0.000000e+00 : f32
    %31 = arith.subf %cst_11, %1 : f32
    %32 = vector.shape_cast %30 : vector<40x1xf32> to vector<1x40x1xf32>
    %cst_12 = arith.constant dense<0.000000e+00> : vector<1xf32>
    %33 = vector.multi_reduction <add>, %32, %cst_12 [1, 2] : vector<1x40x1xf32> to vector<1xf32>
    %34 = vector.shape_cast %33 : vector<1xf32> to vector<1x1x1xf32>
    %35 = vector.extract %34[0, 0, 0] : f32 from vector<1x1x1xf32>
    %cst_13 = arith.constant 2.500000e-02 : f32
    %36 = arith.mulf %35, %cst_13 : f32
    %37 = arith.mulf %31, %36 : f32
    %cst_14 = arith.constant 5.000000e-01 : f32
    %cst_15 = arith.constant 2.000000e+00 : f32
    %38 = arith.mulf %cst_14, %cst_15 : f32
    %cst_16 = arith.constant 2.000000e+00 : f32
    %39 = arith.mulf %cst_16, %0 : f32
    %cst_17 = arith.constant 1.000000e+00 : f32
    %40 = arith.subf %39, %cst_17 : f32
    %41 = arith.mulf %38, %40 : f32
    %42 = arith.addf %37, %41 : f32
    %cst_18 = arith.constant 4.15888309 : f32
    %43 = arith.addf %42, %cst_18 : f32
    %c0_19 = arith.constant 0 : index
    %44 = memref.load %arg4[%c0_19] : memref<1xf32, #tpu.memory_space<smem>>
    memref.store %43, %arg4[%c0_19] : memref<1xf32, #tpu.memory_space<smem>>
    return
  }
}

</mosaic_0001>

<bundles_post_ra>
// kernel: _tlse_forward.1
= control target key start
LH: loop header
LB: loop body
LE: loop exit
PB: predicated region body
PF: predicated region fallthrough
CT: control target
= control target key end

     0   :  { %v284_v2 = vmov 1   ;;  %v285_v3 = vmov 0   ;;  %s367_s0 = inlined_call_operand.<no memory space> [shape: f32[1], index: 0, kind: input, shape index: {}]   ;;  %s368_s1 = inlined_call_operand.<no memory space> [shape: f32[1], index: 1, kind: input, shape index: {}]   ;;  %s369_s2 = inlined_call_operand.vmem [shape: f32[2,64], index: 2, kind: input, shape index: {}]   ;;  %s370_s3 = inlined_call_operand.vmem [shape: f32[40,2], index: 3, kind: input, shape index: {}]   ;;  %s371_s4 = inlined_call_operand.hbm [shape: f32[1], index: 4, kind: output, shape index: {}]  }
   0x1   :  { %v38_v0 = vld [vmem:[%s370_s3] sm:$0xff]  ;;  %v22_v1 = vstv %s367_s0  ;;  %244 = vset.pattern.permute.xlu1 %v284_v2  ;;  %243 = vset.pattern.permute.xlu0 %v285_v3 }
   0x2   :  { %v23_v4 = vmul.f32 1.442695, %v22_v1  ;;  %78 = vperm.xlu1 %244, %v38_v0   ;;  %45 = vperm.xlu0 %243, %v38_v0  }
   0x3   :  { %11 = vsyncpa [#allocation5], 0  ;;  %v39_v5 = vld [vmem:[%s370_s3 + $0x8] sm:$0xff]  ;;  %v40_v6 = vld [vmem:[%s370_s3 + $0x10] sm:$0xff]  ;;  %v32_v10 = vstv %s368_s1  ;;  %vm127_vm0 = vcmask 523264   ;;  %vm189_vm1 = vcmask 7168  }
   0x4   :  { %246 = vpow2.f32 %v23_v4  ;;  %v41_v7 = vld [vmem:[%s370_s3 + $0x18] sm:$0xff]  ;;  %v42_v9 = vld [vmem:[%s370_s3 + $0x20] sm:$0xff]  ;;  %s210_s14 = smul.f32 2.0, %s367_s0  ;;  %s188_s17 = ssub.f32 0.0, %s368_s1 }
   0x5   :  { %248 = vrcp.f32 %v32_v10  ;;  %v230_v14 = vld [vmem:[%s369_s2 + $0x1] ss:$0 sm:$0xff]  ;;  %v229_v15 = vld [vmem:[%s369_s2] ss:$0 sm:$0xff]  ;;  %s272_s26 = scalar_lea.hbm %s371_s4, 16 }
   0x6   :  { %82 = vperm.xlu1 %244, %v39_v5   ;;  %50 = vperm.xlu0 %243, %v39_v5   ;;  %s231_s20 = sadd.f32 -1.0, %s210_s14  ;;  %p273_p0 = scmp.ne.s32.totalorder %s371_s4, %s272_s26 }
   0x7   :  { %p276_p1 = scmp.lt.u32.totalorder %s272_s26, %s371_s4 }
   0x9   :  { %p278_p2 = pnand %p276_p1, %p273_p0 }
   0xa   :  { %86 = vperm.xlu1 %244, %v40_v6   ;;  %55 = vperm.xlu0 %243, %v40_v6  }
   0xe   :  { %v247_v8 = vpop.eup %246  ;;  %90 = vperm.xlu1 %244, %v41_v7   ;;  %60 = vperm.xlu0 %243, %v41_v7  }
   0xf   :  { %232 = vpush %v247_v8  ;;  %v249_v12 = vpop.eup %248 }
  0x12   :  { %94 = vperm.xlu1 %244, %v42_v9   ;;  %65 = vperm.xlu0 %243, %v42_v9  }
  0x16   :  { %245 = vset.pattern.permute.xlu0 %v284_v2 }
  0x40   :  { %s233_s27 = spop %232 }
  0x41   :  { %s26_s28 = smul.f32 2.0, %s233_s27 }
  0x43   :  { %s27_s5 = smul.f32 %s233_s27, %s26_s28 }
  0x45   :  { %v28_v11 = vstv %s27_s5 }
  0x46   :  { %250 = vrcp.f32 %v28_v11 }
  0x50   :  { %v251_v13 = vpop.eup %250 }
  0x51   :  { %234 = vpush %v251_v13 }
  0x52   :  { %236 = vpush %v249_v12 }
  0x81   :  { %v79_v16 = vpop.permute.xlu1 %78  ;;  %v46_v17 = vpop.permute.xlu0 %45 }
  0x82   :  { %s235_s9 = spop %234  ;;  %v101_v18 = vsub.f32 %v79_v16, %v230_v14  ;;  %v72_v19 = vsub.f32 %v46_v17, %v229_v15 }
  0x83   :  { %s31_s10 = smul.f32 -1.0, %s235_s9  ;;  %s237_s11 = spop %236 }
  0x84   :  { %v111_v20 = vmul.f32 %v101_v18, %v101_v18  ;;  %v106_v21 = vmul.f32 %v72_v19, %v72_v19 }
  0x85   :  { %s35_s12 = smul.f32 %s237_s11, %s31_s10  ;;  %v83_v22 = vpop.permute.xlu1 %82  ;;  %v51_v23 = vpop.permute.xlu0 %50 }
  0x86   :  { %v116_v24 = vadd.f32 %v111_v20, %v106_v21  ;;  %v102_v26 = vsub.f32 %v83_v22, %v230_v14  ;;  %v73_v27 = vsub.f32 %v51_v23, %v229_v15 }
  0x87   :  { %v121_v25 = vstv %s35_s12 }
  0x88   :  { %v112_v28 = vmul.f32 %v102_v26, %v102_v26  ;;  %v107_v29 = vmul.f32 %v73_v27, %v73_v27  ;;  %v122_v30 = vmul.f32 %v121_v25, %v116_v24 }
  0x89   :  { %v87_v31 = vpop.permute.xlu1 %86  ;;  %v56_v32 = vpop.permute.xlu0 %55 }
  0x8a   :  { %v117_v33 = vadd.f32 %v112_v28, %v107_v29  ;;  %v103_v34 = vsub.f32 %v87_v31, %v230_v14  ;;  %v74_v35 = vsub.f32 %v56_v32, %v229_v15  ;;  %v128_v36 = vsel %vm127_vm0, %v122_v30, -inf }
  0x8b   :  { %129 = vmax.xlane.f32.xlu0 %v128_v36 }
  0x8c   :  { %v113_v37 = vmul.f32 %v103_v34, %v103_v34  ;;  %v108_v38 = vmul.f32 %v74_v35, %v74_v35  ;;  %v123_v39 = vmul.f32 %v121_v25, %v117_v33 }
  0x8d   :  { %v91_v40 = vpop.permute.xlu1 %90  ;;  %v61_v41 = vpop.permute.xlu0 %60 }
  0x8e   :  { %v118_v42 = vadd.f32 %v113_v37, %v108_v38  ;;  %v104_v43 = vsub.f32 %v91_v40, %v230_v14  ;;  %v75_v44 = vsub.f32 %v61_v41, %v229_v15  ;;  %v131_v45 = vsel %vm127_vm0, %v123_v39, -inf }
  0x8f   :  { %132 = vmax.xlane.f32.xlu1 %v131_v45 }
  0x90   :  { %v114_v46 = vmul.f32 %v104_v43, %v104_v43  ;;  %v109_v47 = vmul.f32 %v75_v44, %v75_v44  ;;  %v124_v48 = vmul.f32 %v121_v25, %v118_v42 }
  0x91   :  { %v95_v49 = vpop.permute.xlu1 %94  ;;  %v66_v50 = vpop.permute.xlu0 %65 }
  0x92   :  { %v119_v51 = vadd.f32 %v114_v46, %v109_v47  ;;  %v105_v52 = vsub.f32 %v95_v49, %v230_v14  ;;  %v76_v53 = vsub.f32 %v66_v50, %v229_v15  ;;  %v134_v54 = vsel %vm127_vm0, %v124_v48, -inf }
  0x93   :  { %135 = vmax.xlane.f32.xlu0 %v134_v54 }
  0x94   :  { %v115_v55 = vmul.f32 %v105_v52, %v105_v52  ;;  %v110_v56 = vmul.f32 %v76_v53, %v76_v53  ;;  %v125_v57 = vmul.f32 %v121_v25, %v119_v51 }
  0x96   :  { %v120_v58 = vadd.f32 %v115_v55, %v110_v56  ;;  %v137_v59 = vsel %vm127_vm0, %v125_v57, -inf }
  0x97   :  { %138 = vmax.xlane.f32.xlu0 %v137_v59 }
  0x98   :  { %v126_v60 = vmul.f32 %v121_v25, %v120_v58 }
  0x9a   :  { %v140_v61 = vsel %vm127_vm0, %v126_v60, -inf }
  0x9b   :  { %141 = vmax.xlane.f32.xlu1 %v140_v61 }
 0x118   :  { %v130_v62 = vpop.xlane.xlu0 %129 }
 0x119   :  { %v143_v63 = vsub.f32 %v122_v30, %v130_v62 }
 0x11b   :  { %v148_v0 = vmul.f32 1.442695, %v143_v63 }
 0x11c   :  { %v133_v1 = vpop.xlane.xlu1 %132 }
 0x11d   :  { %252 = vpow2.f32 %v148_v0  ;;  %v144_v2 = vsub.f32 %v123_v39, %v133_v1 }
 0x11f   :  { %v150_v3 = vmul.f32 1.442695, %v144_v2 }
 0x120   :  { %v136_v4 = vpop.xlane.xlu0 %135 }
 0x121   :  { %254 = vpow2.f32 %v150_v3  ;;  %v145_v5 = vsub.f32 %v124_v48, %v136_v4 }
 0x123   :  { %v152_v6 = vmul.f32 1.442695, %v145_v5 }
 0x124   :  { %v139_v7 = vpop.xlane.xlu0 %138 }
 0x125   :  { %256 = vpow2.f32 %v152_v6  ;;  %v146_v8 = vsub.f32 %v125_v57, %v139_v7 }
 0x127   :  { %v253_v9 = vpop.eup %252  ;;  %v154_v10 = vmul.f32 1.442695, %v146_v8 }
 0x128   :  { %v142_v11 = vpop.xlane.xlu1 %141  ;;  %v158_v12 = vsel %vm127_vm0, %v253_v9, 0.0 }
 0x129   :  { %258 = vpow2.f32 %v154_v10  ;;  %v147_v13 = vsub.f32 %v126_v60, %v142_v11  ;;  %159 = vadd.xlane.f32.xlu0 %v158_v12 }
 0x12b   :  { %v255_v14 = vpop.eup %254  ;;  %v156_v15 = vmul.f32 1.442695, %v147_v13 }
 0x12c   :  { %v161_v16 = vsel %vm127_vm0, %v255_v14, 0.0 }
 0x12d   :  { %260 = vpow2.f32 %v156_v15  ;;  %162 = vadd.xlane.f32.xlu1 %v161_v16 }
 0x12f   :  { %v257_v17 = vpop.eup %256 }
 0x130   :  { %v164_v18 = vsel %vm127_vm0, %v257_v17, 0.0 }
 0x131   :  { %165 = vadd.xlane.f32.xlu0 %v164_v18 }
 0x133   :  { %v259_v19 = vpop.eup %258 }
 0x134   :  { %v167_v20 = vsel %vm127_vm0, %v259_v19, 0.0 }
 0x135   :  { %168 = vadd.xlane.f32.xlu1 %v167_v20 }
 0x137   :  { %v261_v21 = vpop.eup %260 }
 0x138   :  { %v170_v22 = vsel %vm127_vm0, %v261_v21, 0.0 }
 0x139   :  { %171 = vadd.xlane.f32.xlu0 %v170_v22 }
 0x1b6   :  { %v160_v23 = vpop.xlane.xlu0 %159 }
 0x1b7   :  { %262 = vlog2.f32 %v160_v23 }
 0x1ba   :  { %v163_v24 = vpop.xlane.xlu1 %162 }
 0x1bb   :  { %264 = vlog2.f32 %v163_v24 }
 0x1be   :  { %v166_v25 = vpop.xlane.xlu0 %165 }
 0x1bf   :  { %266 = vlog2.f32 %v166_v25 }
 0x1c1   :  { %v263_v27 = vpop.eup %262 }
 0x1c2   :  { %v169_v26 = vpop.xlane.xlu1 %168  ;;  %v174_v31 = vmul.f32 0.6931472, %v263_v27 }
 0x1c3   :  { %268 = vlog2.f32 %v169_v26 }
 0x1c4   :  { %v183_v35 = vadd.f32 %v174_v31, %v130_v62 }
 0x1c5   :  { %v265_v28 = vpop.eup %264 }
 0x1c6   :  { %v176_v29 = vmul.f32 0.6931472, %v265_v28  ;;  %v172_v30 = vpop.xlane.xlu0 %171  ;;  %v190_v40 = vsel %vm189_vm1, %v183_v35, 0.0 }
 0x1c7   :  { %270 = vlog2.f32 %v172_v30 }
 0x1c8   :  { %v184_v33 = vadd.f32 %v176_v29, %v133_v1 }
 0x1c9   :  { %v267_v32 = vpop.eup %266 }
 0x1ca   :  { %v178_v34 = vmul.f32 0.6931472, %v267_v32  ;;  %v191_v38 = vsel %vm189_vm1, %v184_v33, 0.0 }
 0x1cb   :  { %v192_v44 = vadd.f32 %v191_v38, %v190_v40 }
 0x1cc   :  { %v185_v36 = vadd.f32 %v178_v34, %v136_v4 }
 0x1cd   :  { %v269_v37 = vpop.eup %268 }
 0x1ce   :  { %v180_v39 = vmul.f32 0.6931472, %v269_v37  ;;  %v193_v42 = vsel %vm189_vm1, %v185_v36, 0.0 }
 0x1cf   :  { %v194_v47 = vadd.f32 %v193_v42, %v192_v44 }
 0x1d0   :  { %v186_v41 = vadd.f32 %v180_v39, %v139_v7 }
 0x1d1   :  { %v271_v43 = vpop.eup %270 }
 0x1d2   :  { %v182_v45 = vmul.f32 0.6931472, %v271_v43  ;;  %v195_v46 = vsel %vm189_vm1, %v186_v41, 0.0 }
 0x1d3   :  { %v196_v49 = vadd.f32 %v195_v46, %v194_v47 }
 0x1d4   :  { %v187_v48 = vadd.f32 %v182_v45, %v142_v11 }
 0x1d6   :  { %v197_v50 = vsel %vm189_vm1, %v187_v48, 0.0 }
 0x1d7   :  { %v198_v51 = vadd.f32 %v197_v50, %v196_v49 }
 0x1d9   :  { %199 = vadd.xlane.f32.xlu1 %v198_v51 }
 0x266   :  { %v200_v52 = vpop.xlane.xlu1 %199 }
 0x267   :  { %v201_v53 = vrot.slane %v200_v52, 4 }
 0x269   :  { %v202_v54 = vadd.f32 %v201_v53, %v200_v52 }
 0x26b   :  { %v203_v55 = vrot.slane %v202_v54, 2 }
 0x26d   :  { %v204_v56 = vadd.f32 %v203_v55, %v202_v54 }
 0x26f   :  { %v205_v57 = vrot.slane %v204_v56, 1 }
 0x271   :  { %v206_v58 = vadd.f32 %v205_v57, %v204_v56 }
 0x273   :  { %238 = vpush %v206_v58 }
 0x2a4   :  { %s239_s18 = spop %238 }
 0x2a5   :  { %s208_s19 = smul.f32 0.025, %s239_s18 }
 0x2a7   :  { %s209_s21 = smul.f32 %s208_s19, %s188_s17 }
 0x2a9   :  { %s212_s22 = sadd.f32 %s231_s20, %s209_s21 }
 0x2ab   :  { %s213_s23 = sadd.f32 4.158883, %s212_s22 }
 0x2ad   :  { %215 = sst [smem:[#allocation4]] %s213_s23 }
 0x2ae   :  { %281 = shalt.err (!%p278_p2)
}
 0x2af   :  { %s286_s1 = smov [#allocation4]  }
 0x2b0   :  { %223 = dma.smem_to_hbm %s286_s1, 16, %s371_s4, [#allocation5]  }
 0x2b1   :  { %282 = dma.done.wait [#allocation5], 16  }
 0x2b2   :  { %283 = vsyncadd [#allocation5], 4294967280 }
 0x2b3   :  { %227 = sfence }
 0x2b4   :  { %228 = vsyncpa [#allocation5], 1 }

</bundles_post_ra>
